<compile_context>
chip_gen: v7x
topology: tpu7x:2x2x1
jax: 0.10.0
libtpu: 0.0.40
codegen_flags: <defaults>
</compile_context>

<pallas_src>
import functools

import jax
import jax.numpy as jnp
from jax.experimental import pallas as pl
from jax.experimental.pallas import tpu as pltpu

# Fixed category pairs from the reference implementation.
CATEGORY_PAIRS = ((0, 1), (0, 2), (2, 3), (1, 4), (1, 2), (2, 4))
_NUM_CATEGORIES = 5

# Bitmask over keys a*5+b: bit set iff (a, b) (either order) is a negative pair.
_NEG_MASK_BITS = 0
for _a, _b in CATEGORY_PAIRS:
    _NEG_MASK_BITS |= 1 << (_a * _NUM_CATEGORIES + _b)
    _NEG_MASK_BITS |= 1 << (_b * _NUM_CATEGORIES + _a)


def _contrastive_kernel(x_ref, lab_row_ref, lab_col_ref, out_ref, gram_ref, *,
                        inv_sqrt_temp):
    k = pl.program_id(0)

    @pl.when(k == 0)
    def _init():
        gram_ref[...] = jnp.zeros_like(gram_ref)

    # Partial Gram accumulation on the MXU; contraction over dim 1 of both
    # operands -> no explicit transpose of the (B, tk) tile.  bf16 operands
    # are exact under f32 accumulation.
    xb = x_ref[...]                                            # (B, tk)
    gram_ref[...] += jax.lax.dot_general(
        xb, xb,
        dimension_numbers=(((1,), (1,)), ((), ())),
        preferred_element_type=jnp.float32)

    @pl.when(k == pl.num_programs(0) - 1)
    def _epilogue():
        gram = gram_ref[...]                                   # (B, B) f32
        B = gram.shape[0]

        rows = jax.lax.broadcasted_iota(jnp.int32, (B, B), 0)
        cols = jax.lax.broadcasted_iota(jnp.int32, (B, B), 1)
        diag = rows == cols

        # ||x_i||^2 = G[i, i]; pull the diagonal out in both orientations.
        diag_vals = jnp.where(diag, gram, 0.0)
        sumsq_col = jnp.sum(diag_vals, axis=1, keepdims=True)  # (B, 1)
        sumsq_row = jnp.sum(diag_vals, axis=0, keepdims=True)  # (1, B)

        # F.normalize(p=2, dim=1) with eps=1e-12, and 1/sqrt(temperature)
        # folded into each side (so the product carries 1/temperature).
        r_col = inv_sqrt_temp / jnp.maximum(jnp.sqrt(sumsq_col), 1e-12)
        r_row = inv_sqrt_temp / jnp.maximum(jnp.sqrt(sumsq_row), 1e-12)

        # Reuse the Gram scratch for `sim` -> one fewer live (B, B) temporary
        # in the epilogue (matters for large B on v7x's 64 MiB VMEM).
        gram_ref[...] = gram * r_col * r_row
        sim = gram_ref[...]                                    # (B, B)

        # log_softmax statistics; `logits` itself is never materialized.
        m = jnp.max(sim, axis=-1, keepdims=True)               # (B, 1)
        z = sim - m
        log_z = jnp.log(jnp.sum(jnp.exp(z), axis=-1, keepdims=True))  # (B, 1)

        lab_row = lab_row_ref[...]                             # (1, B): labels[j]
        lab_col = lab_col_ref[...]                             # (B, 1): labels[i]

        # Positive mask: same label, diagonal excluded.
        pos_bool = (lab_row == lab_col) & jnp.logical_not(diag)

        # Negative mask: single scalar-bitmask lookup (key = 5*label_i + label_j).
        valid = ((lab_row >= 0) & (lab_row < _NUM_CATEGORIES)
                 & (lab_col >= 0) & (lab_col < _NUM_CATEGORIES))
        key = jnp.where(valid, lab_col * _NUM_CATEGORIES + lab_row, 0)
        neg_bool = (jnp.right_shift(jnp.int32(_NEG_MASK_BITS), key) & 1) != 0

        pos_cnt = jnp.sum(pos_bool.astype(jnp.float32), axis=-1, keepdims=True)
        neg_cnt = jnp.sum(neg_bool.astype(jnp.float32), axis=-1, keepdims=True)

        # sum_mask(logits) = sum_mask(z) - cnt * logZ  (saves full (B,B) passes).
        pos_sum = (jnp.sum(jnp.where(pos_bool, z, 0.0), axis=-1, keepdims=True)
                   - pos_cnt * log_z)
        neg_sum = (jnp.sum(jnp.where(neg_bool, z, 0.0), axis=-1, keepdims=True)
                   - neg_cnt * log_z)

        pos_loss = -pos_sum / jnp.maximum(pos_cnt, 1e-8)       # (B, 1)
        neg_loss = -neg_sum / jnp.maximum(neg_cnt, 1e-8)       # (B, 1)

        pos_loss = pos_loss / jnp.max(pos_loss, keepdims=True)
        neg_loss = 1.0 - neg_loss / jnp.max(neg_loss, keepdims=True)

        out_ref[...] = jnp.sum(pos_loss + neg_loss, keepdims=True) * (1.0 / B)


def _scoped_vmem_budget_bytes() -> int:
    """~Half the physical per-core VMEM (generation aware), conservative fallback."""
    phys = 64 * 1024 * 1024                      # safe floor (v7x per-core physical)
    try:
        phys = int(pltpu.get_tpu_info().vmem_capacity_bytes)
    except Exception:  # non-TPU backend / older jax: keep the conservative floor
        pass
    return max(phys // 2, 16 * 1024 * 1024)


def _pick_tk(B: int, T: int, itemsize: int, budget: int) -> int:
    """Largest 128-multiple K tile whose double-buffered input block fits the budget."""
    # Reserve the resident (B,B) f32 Gram scratch, a few (B,B) f32 epilogue
    # temporaries, and fixed slack for labels/output/compiler scratch.
    reserve = 5 * B * B * 4 + (2 << 20)
    avail = max(budget - reserve, 2 * B * 128 * itemsize)
    tk = (avail // (2 * B * itemsize)) // 128 * 128
    tk = max(tk, 128)
    t128 = ((T + 127) // 128) * 128
    return min(tk, t128)


def contrastive_loss(inputs, labels, temperature=0.2, margin=10):
    """JAX/Pallas equivalent of ContrastiveLoss.forward (margin is unused there)."""
    del margin  # constructed in the module but never used in forward
    B, T = inputs.shape
    if T == 1:
        return jnp.float32(0.0)

    # Keep bf16 inputs as bf16 (halves HBM traffic; bf16xbf16->f32 MXU is exact);
    # everything else runs in f32 for exactness vs the PyTorch reference.
    x = inputs if inputs.dtype == jnp.bfloat16 else inputs.astype(jnp.float32)
    itemsize = x.dtype.itemsize

    budget = _scoped_vmem_budget_bytes()
    tk = _pick_tk(B, T, itemsize, budget)

    # Zero-pad T up to a multiple of tk (zeros do not change the Gram matrix),
    # keeping the double-buffered pipeline and 128-lane alignment.
    t_pad = ((T + tk - 1) // tk) * tk
    if t_pad != T:
        x = jnp.pad(x, ((0, 0), (0, t_pad - T)))
    num_k = t_pad // tk

    # Labels passed as (1, B) and (B, 1) views so the (B, B) pair masks are
    # built by pure broadcasting in-kernel (no lane<->sublane transpose).
    lab_row = labels.reshape(1, B).astype(jnp.int32)
    lab_col = labels.reshape(B, 1).astype(jnp.int32)

    kernel = functools.partial(
        _contrastive_kernel, inv_sqrt_temp=float(temperature) ** -0.5)

    out = pl.pallas_call(
        kernel,
        out_shape=jax.ShapeDtypeStruct((1, 1), jnp.float32),
        grid_spec=pltpu.PrefetchScalarGridSpec(
            num_scalar_prefetch=0,
            grid=(num_k,),
            in_specs=[
                pl.BlockSpec((B, tk), lambda k: (0, k)),   # feature-tiled input
                pl.BlockSpec((1, B), lambda k: (0, 0)),    # labels, row view
                pl.BlockSpec((B, 1), lambda k: (0, 0)),    # labels, col view
            ],
            out_specs=pl.BlockSpec((1, 1), lambda k: (0, 0)),
            scratch_shapes=[pltpu.VMEM((B, B), jnp.float32)],   # Gram accumulator
        ),
        compiler_params=pltpu.CompilerParams(
            # K axis is a reduction into the resident (B, B) accumulator.
            dimension_semantics=("arbitrary",),
            vmem_limit_bytes=int(budget),
        ),
    )(x, lab_row, lab_col)
    return out[0, 0]


def _reference(inputs, labels, temperature=0.2):
    """Pure-JAX re-statement of the PyTorch forward, for sanity checking."""
    B, T = inputs.shape
    xn = inputs / jnp.maximum(
        jnp.sqrt(jnp.sum(inputs * inputs, axis=1, keepdims=True)), 1e-12
    )
    sim = jnp.einsum("it,jt->ij", xn, xn,
                     precision=jax.lax.Precision.HIGHEST) / temperature
    logits = jax.nn.log_softmax(sim, axis=-1)
    pos_mask = (labels[None, :] == labels[:, None]).astype(jnp.float32)
    pos_mask = pos_mask * (1.0 - jnp.eye(B, dtype=jnp.float32))
    li = labels[None, :]
    lj = labels[:, None]
    neg = jnp.zeros((B, B), dtype=bool)
    for a, b in CATEGORY_PAIRS:
        neg = neg | (((li == a) & (lj == b)) | ((li == b) & (lj == a)))
    neg_mask = neg.astype(jnp.float32)
    pos_div = jnp.maximum(pos_mask.sum(-1), 1e-8)
    neg_div = jnp.maximum(neg_mask.sum(-1), 1e-8)
    pos_loss = -(logits * pos_mask).sum(-1) / pos_div
    neg_loss = -(logits * neg_mask).sum(-1) / neg_div
    pos_loss = pos_loss / pos_loss.max()
    neg_loss = 1.0 - neg_loss / neg_loss.max()
    return jnp.mean(pos_loss + neg_loss)


if __name__ == "__main__":
    key = jax.random.PRNGKey(0)
    B, T = 8, 32
    inputs = jax.random.normal(key, (B, T), dtype=jnp.float32)
    labels = jnp.array([0, 1, 2, 3, 4, 0, 1, 2], dtype=jnp.int32)

    loss = jax.block_until_ready(contrastive_loss(inputs, labels, temperature=0.2))
    ref = jax.block_until_ready(_reference(inputs, labels, temperature=0.2))
    assert jnp.allclose(loss, ref, rtol=1e-4, atol=1e-5), (loss, ref)

    print("KERNEL_OK")
</pallas_src>

<mosaic_0001>
module attributes {stable_mosaic.version = 11 : i64} {
  func.func @_contrastive_kernel(%arg0: i32, %arg1: memref<8x128xf32, #tpu.memory_space<vmem>>, %arg2: memref<1x8xi32, #tpu.memory_space<vmem>>, %arg3: memref<8x1xi32, #tpu.memory_space<vmem>>, %arg4: memref<1x1xf32, #tpu.memory_space<vmem>>, %arg5: memref<8x8xf32, #tpu.memory_space<vmem>>) attributes {dimension_semantics = [#tpu.dimension_semantics<arbitrary>], iteration_bounds = array<i64: 1>, scalar_prefetch = 0 : i64, scratch_operands = 1 : i64, tpu.core_type = #tpu.core_type<tc>, window_params = [{transform_indices = @transform_0, window_bounds = array<i64: 8, 128>}, {pipeline_mode = #tpu.pipeline_mode<synchronous>, transform_indices = @transform_1, window_bounds = array<i64: 1, 8>}, {pipeline_mode = #tpu.pipeline_mode<synchronous>, transform_indices = @transform_2, window_bounds = array<i64: 8, 1>}, {pipeline_mode = #tpu.pipeline_mode<synchronous>, transform_indices = @transform_3, window_bounds = array<i64: 1, 1>}]} {
    %c0_i32 = arith.constant 0 : i32
    %0 = arith.cmpi eq, %arg0, %c0_i32 : i32
    %1 = arith.extui %0 : i1 to i32
    %c0_i32_0 = arith.constant 0 : i32
    %2 = arith.cmpi ne, %1, %c0_i32_0 : i32
    scf.if %2 {
      %cst_8 = arith.constant 0.000000e+00 : f32
      %11 = vector.broadcast %cst_8 : f32 to vector<8x8xf32>
      %c0_9 = arith.constant 0 : index
      %c0_10 = arith.constant 0 : index
      %12 = vector.load %arg5[%c0_9, %c0_10] : memref<8x8xf32, #tpu.memory_space<vmem>>, vector<8x8xf32>
      tpu.vector_store %arg5[%c0_9, %c0_10], %11 {strides = array<i32>} : memref<8x8xf32, #tpu.memory_space<vmem>>, vector<8x8xf32>,
    } else {
    }
    %c0 = arith.constant 0 : index
    %c0_1 = arith.constant 0 : index
    %3 = vector.load %arg1[%c0, %c0_1] : memref<8x128xf32, #tpu.memory_space<vmem>>, vector<8x128xf32>
    %c0_2 = arith.constant 0 : index
    %c0_3 = arith.constant 0 : index
    %4 = vector.load %arg5[%c0_2, %c0_3] : memref<8x8xf32, #tpu.memory_space<vmem>>, vector<8x8xf32>
    %cst = arith.constant dense<0.000000e+00> : vector<8x8xf32>
    %5 = tpu.matmul %3, %3, %cst {dimension_numbers = #tpu.dot_dimension_numbers<[1], [1], [0], [0], [0, 0, 1, 0], [], []>} : vector<8x128xf32>, vector<8x128xf32>, vector<8x8xf32> -> vector<8x8xf32>
    %6 = arith.addf %4, %5 : vector<8x8xf32>
    %c0_4 = arith.constant 0 : index
    %c0_5 = arith.constant 0 : index
    %7 = vector.load %arg5[%c0_4, %c0_5] : memref<8x8xf32, #tpu.memory_space<vmem>>, vector<8x8xf32>
    tpu.vector_store %arg5[%c0_4, %c0_5], %6 {strides = array<i32>} : memref<8x8xf32, #tpu.memory_space<vmem>>, vector<8x8xf32>,
    %c0_i32_6 = arith.constant 0 : i32
    %8 = arith.cmpi eq, %arg0, %c0_i32_6 : i32
    %9 = arith.extui %8 : i1 to i32
    %c0_i32_7 = arith.constant 0 : i32
    %10 = arith.cmpi ne, %9, %c0_i32_7 : i32
    scf.if %10 {
      %c0_8 = arith.constant 0 : index
      %c0_9 = arith.constant 0 : index
      %11 = vector.load %arg5[%c0_8, %c0_9] : memref<8x8xf32, #tpu.memory_space<vmem>>, vector<8x8xf32>
      %12 = tpu.iota {dimensions = array<i32: 0>} : vector<8x8xi32>
      %13 = tpu.iota {dimensions = array<i32: 1>} : vector<8x8xi32>
      %14 = arith.cmpi eq, %12, %13 : vector<8x8xi32>
      %cst_10 = arith.constant 0.000000e+00 : f32
      %15 = vector.broadcast %cst_10 : f32 to vector<8x8xf32>
      %16 = arith.select %14, %11, %15 : vector<8x8xi1>, vector<8x8xf32>
      %cst_11 = arith.constant dense<0.000000e+00> : vector<8xf32>
      %17 = vector.multi_reduction <add>, %16, %cst_11 [1] : vector<8x8xf32> to vector<8xf32>
      %18 = vector.shape_cast %17 : vector<8xf32> to vector<8x1xf32>
      %cst_12 = arith.constant dense<0.000000e+00> : vector<8xf32>
      %19 = vector.multi_reduction <add>, %16, %cst_12 [0] : vector<8x8xf32> to vector<8xf32>
      %20 = vector.shape_cast %19 : vector<8xf32> to vector<1x8xf32>
      %21 = math.sqrt %18 : vector<8x1xf32>
      %cst_13 = arith.constant 9.99999996E-13 : f32
      %22 = vector.broadcast %cst_13 : f32 to vector<8x1xf32>
      %23 = arith.maximumf %21, %22 : vector<8x1xf32>
      %cst_14 = arith.constant 2.23606801 : f32
      %24 = vector.broadcast %cst_14 : f32 to vector<8x1xf32>
      %25 = arith.divf %24, %23 : vector<8x1xf32>
      %26 = math.sqrt %20 : vector<1x8xf32>
      %cst_15 = arith.constant 9.99999996E-13 : f32
      %27 = vector.broadcast %cst_15 : f32 to vector<1x8xf32>
      %28 = arith.maximumf %26, %27 : vector<1x8xf32>
      %cst_16 = arith.constant 2.23606801 : f32
      %29 = vector.broadcast %cst_16 : f32 to vector<1x8xf32>
      %30 = arith.divf %29, %28 : vector<1x8xf32>
      %31 = vector.broadcast %25 : vector<8x1xf32> to vector<8x8xf32>
      %32 = arith.mulf %11, %31 : vector<8x8xf32>
      %33 = vector.broadcast %30 : vector<1x8xf32> to vector<8x8xf32>
      %34 = arith.mulf %32, %33 : vector<8x8xf32>
      %c0_17 = arith.constant 0 : index
      %c0_18 = arith.constant 0 : index
      %35 = vector.load %arg5[%c0_17, %c0_18] : memref<8x8xf32, #tpu.memory_space<vmem>>, vector<8x8xf32>
      tpu.vector_store %arg5[%c0_17, %c0_18], %34 {strides = array<i32>} : memref<8x8xf32, #tpu.memory_space<vmem>>, vector<8x8xf32>,
      %c0_19 = arith.constant 0 : index
      %c0_20 = arith.constant 0 : index
      %36 = vector.load %arg5[%c0_19, %c0_20] : memref<8x8xf32, #tpu.memory_space<vmem>>, vector<8x8xf32>
      %cst_21 = arith.constant dense<0xFF800000> : vector<8xf32>
      %37 = vector.multi_reduction <maximumf>, %36, %cst_21 [1] : vector<8x8xf32> to vector<8xf32>
      %38 = vector.shape_cast %37 : vector<8xf32> to vector<8x1xf32>
      %39 = vector.broadcast %38 : vector<8x1xf32> to vector<8x8xf32>
      %40 = arith.subf %36, %39 : vector<8x8xf32>
      %41 = math.exp %40 : vector<8x8xf32>
      %cst_22 = arith.constant dense<0.000000e+00> : vector<8xf32>
      %42 = vector.multi_reduction <add>, %41, %cst_22 [1] : vector<8x8xf32> to vector<8xf32>
      %43 = vector.shape_cast %42 : vector<8xf32> to vector<8x1xf32>
      %44 = math.log %43 : vector<8x1xf32>
      %c0_23 = arith.constant 0 : index
      %c0_24 = arith.constant 0 : index
      %45 = vector.load %arg2[%c0_23, %c0_24] : memref<1x8xi32, #tpu.memory_space<vmem>>, vector<1x8xi32>
      %c0_25 = arith.constant 0 : index
      %c0_26 = arith.constant 0 : index
      %46 = vector.load %arg3[%c0_25, %c0_26] : memref<8x1xi32, #tpu.memory_space<vmem>>, vector<8x1xi32>
      %47 = vector.broadcast %45 : vector<1x8xi32> to vector<8x8xi32>
      %48 = vector.broadcast %46 : vector<8x1xi32> to vector<8x8xi32>
      %49 = arith.cmpi eq, %47, %48 : vector<8x8xi32>
      %cst_27 = arith.constant dense<true> : vector<8x8xi1>
      %50 = arith.xori %14, %cst_27 : vector<8x8xi1>
      %51 = arith.andi %49, %50 : vector<8x8xi1>
      %c0_i32_28 = arith.constant 0 : i32
      %52 = vector.broadcast %c0_i32_28 : i32 to vector<1x8xi32>
      %53 = arith.cmpi sge, %45, %52 : vector<1x8xi32>
      %c5_i32 = arith.constant 5 : i32
      %54 = vector.broadcast %c5_i32 : i32 to vector<1x8xi32>
      %55 = arith.cmpi slt, %45, %54 : vector<1x8xi32>
      %56 = arith.andi %53, %55 : vector<1x8xi1>
      %c0_i32_29 = arith.constant 0 : i32
      %57 = vector.broadcast %c0_i32_29 : i32 to vector<8x1xi32>
      %58 = arith.cmpi sge, %46, %57 : vector<8x1xi32>
      %59 = vector.broadcast %56 : vector<1x8xi1> to vector<8x8xi1>
      %60 = vector.broadcast %58 : vector<8x1xi1> to vector<8x8xi1>
      %61 = arith.andi %59, %60 : vector<8x8xi1>
      %c5_i32_30 = arith.constant 5 : i32
      %62 = vector.broadcast %c5_i32_30 : i32 to vector<8x1xi32>
      %63 = arith.cmpi slt, %46, %62 : vector<8x1xi32>
      %64 = vector.broadcast %63 : vector<8x1xi1> to vector<8x8xi1>
      %65 = arith.andi %61, %64 : vector<8x8xi1>
      %c5_i32_31 = arith.constant 5 : i32
      %66 = vector.broadcast %c5_i32_31 : i32 to vector<8x1xi32>
      %67 = arith.muli %46, %66 : vector<8x1xi32>
      %68 = vector.broadcast %67 : vector<8x1xi32> to vector<8x8xi32>
      %69 = vector.broadcast %45 : vector<1x8xi32> to vector<8x8xi32>
      %70 = arith.addi %68, %69 : vector<8x8xi32>
      %c0_i32_32 = arith.constant 0 : i32
      %71 = vector.broadcast %c0_i32_32 : i32 to vector<8x8xi32>
      %72 = arith.select %65, %70, %71 : vector<8x8xi1>, vector<8x8xi32>
      %c6450854_i32 = arith.constant 6450854 : i32
      %73 = vector.broadcast %c6450854_i32 : i32 to vector<8x8xi32>
      %74 = arith.shrsi %73, %72 : vector<8x8xi32>
      %c1_i32 = arith.constant 1 : i32
      %75 = vector.broadcast %c1_i32 : i32 to vector<8x8xi32>
      %76 = arith.andi %74, %75 : vector<8x8xi32>
      %c0_i32_33 = arith.constant 0 : i32
      %77 = vector.broadcast %c0_i32_33 : i32 to vector<8x8xi32>
      %78 = arith.cmpi ne, %76, %77 : vector<8x8xi32>
      %79 = arith.extui %51 : vector<8x8xi1> to vector<8x8xi32>
      %80 = arith.sitofp %79 : vector<8x8xi32> to vector<8x8xf32>
      %cst_34 = arith.constant dense<0.000000e+00> : vector<8xf32>
      %81 = vector.multi_reduction <add>, %80, %cst_34 [1] : vector<8x8xf32> to vector<8xf32>
      %82 = vector.shape_cast %81 : vector<8xf32> to vector<8x1xf32>
      %83 = arith.extui %78 : vector<8x8xi1> to vector<8x8xi32>
      %84 = arith.sitofp %83 : vector<8x8xi32> to vector<8x8xf32>
      %cst_35 = arith.constant dense<0.000000e+00> : vector<8xf32>
      %85 = vector.multi_reduction <add>, %84, %cst_35 [1] : vector<8x8xf32> to vector<8xf32>
      %86 = vector.shape_cast %85 : vector<8xf32> to vector<8x1xf32>
      %cst_36 = arith.constant 0.000000e+00 : f32
      %87 = vector.broadcast %cst_36 : f32 to vector<8x8xf32>
      %88 = arith.select %51, %40, %87 : vector<8x8xi1>, vector<8x8xf32>
      %cst_37 = arith.constant dense<0.000000e+00> : vector<8xf32>
      %89 = vector.multi_reduction <add>, %88, %cst_37 [1] : vector<8x8xf32> to vector<8xf32>
      %90 = vector.shape_cast %89 : vector<8xf32> to vector<8x1xf32>
      %91 = arith.mulf %82, %44 : vector<8x1xf32>
      %92 = arith.subf %90, %91 : vector<8x1xf32>
      %cst_38 = arith.constant 0.000000e+00 : f32
      %93 = vector.broadcast %cst_38 : f32 to vector<8x8xf32>
      %94 = arith.select %78, %40, %93 : vector<8x8xi1>, vector<8x8xf32>
      %cst_39 = arith.constant dense<0.000000e+00> : vector<8xf32>
      %95 = vector.multi_reduction <add>, %94, %cst_39 [1] : vector<8x8xf32> to vector<8xf32>
      %96 = vector.shape_cast %95 : vector<8xf32> to vector<8x1xf32>
      %97 = arith.mulf %86, %44 : vector<8x1xf32>
      %98 = arith.subf %96, %97 : vector<8x1xf32>
      %cst_40 = arith.constant 0.000000e+00 : f32
      %99 = vector.broadcast %cst_40 : f32 to vector<8x1xf32>
      %100 = arith.subf %99, %92 : vector<8x1xf32>
      %cst_41 = arith.constant 9.99999993E-9 : f32
      %101 = vector.broadcast %cst_41 : f32 to vector<8x1xf32>
      %102 = arith.maximumf %82, %101 : vector<8x1xf32>
      %103 = arith.divf %100, %102 : vector<8x1xf32>
      %cst_42 = arith.constant 0.000000e+00 : f32
      %104 = vector.broadcast %cst_42 : f32 to vector<8x1xf32>
      %105 = arith.subf %104, %98 : vector<8x1xf32>
      %cst_43 = arith.constant 9.99999993E-9 : f32
      %106 = vector.broadcast %cst_43 : f32 to vector<8x1xf32>
      %107 = arith.maximumf %86, %106 : vector<8x1xf32>
      %108 = arith.divf %105, %107 : vector<8x1xf32>
      %109 = vector.shape_cast %103 : vector<8x1xf32> to vector<1x8x1xf32>
      %cst_44 = arith.constant dense<0xFF800000> : vector<1xf32>
      %110 = vector.multi_reduction <maximumf>, %109, %cst_44 [1, 2] : vector<1x8x1xf32> to vector<1xf32>
      %111 = vector.shape_cast %110 : vector<1xf32> to vector<1x1x1xf32>
      %112 = vector.extract %111[0, 0, 0] : f32 from vector<1x1x1xf32>
      %113 = vector.broadcast %112 : f32 to vector<1x1xf32>
      %114 = vector.broadcast %113 : vector<1x1xf32> to vector<8x1xf32>
      %115 = arith.divf %103, %114 : vector<8x1xf32>
      %116 = vector.shape_cast %108 : vector<8x1xf32> to vector<1x8x1xf32>
      %cst_45 = arith.constant dense<0xFF800000> : vector<1xf32>
      %117 = vector.multi_reduction <maximumf>, %116, %cst_45 [1, 2] : vector<1x8x1xf32> to vector<1xf32>
      %118 = vector.shape_cast %117 : vector<1xf32> to vector<1x1x1xf32>
      %119 = vector.extract %118[0, 0, 0] : f32 from vector<1x1x1xf32>
      %120 = vector.broadcast %119 : f32 to vector<1x1xf32>
      %121 = vector.broadcast %120 : vector<1x1xf32> to vector<8x1xf32>
      %122 = arith.divf %108, %121 : vector<8x1xf32>
      %cst_46 = arith.constant 1.000000e+00 : f32
      %123 = vector.broadcast %cst_46 : f32 to vector<8x1xf32>
      %124 = arith.subf %123, %122 : vector<8x1xf32>
      %125 = arith.addf %115, %124 : vector<8x1xf32>
      %126 = vector.shape_cast %125 : vector<8x1xf32> to vector<1x8x1xf32>
      %cst_47 = arith.constant dense<0.000000e+00> : vector<1xf32>
      %127 = vector.multi_reduction <add>, %126, %cst_47 [1, 2] : vector<1x8x1xf32> to vector<1xf32>
      %128 = vector.shape_cast %127 : vector<1xf32> to vector<1x1x1xf32>
      %129 = vector.extract %128[0, 0, 0] : f32 from vector<1x1x1xf32>
      %130 = vector.broadcast %129 : f32 to vector<1x1xf32>
      %cst_48 = arith.constant 1.250000e-01 : f32
      %131 = vector.broadcast %cst_48 : f32 to vector<1x1xf32>
      %132 = arith.mulf %130, %131 : vector<1x1xf32>
      %c0_49 = arith.constant 0 : index
      %c0_50 = arith.constant 0 : index
      %133 = vector.load %arg4[%c0_49, %c0_50] : memref<1x1xf32, #tpu.memory_space<vmem>>, vector<1x1xf32>
      tpu.vector_store %arg4[%c0_49, %c0_50], %132 {strides = array<i32>} : memref<1x1xf32, #tpu.memory_space<vmem>>, vector<1x1xf32>,
    } else {
    }
    return
  }
  func.func @transform_0(%arg0: i32) -> (i32, i32) {
    %c0_i32 = arith.constant 0 : i32
    %c0_i32_0 = arith.constant 0 : i32
    return %c0_i32, %arg0 : i32, i32
  }
  func.func @transform_1(%arg0: i32) -> (i32, i32) {
    %c0_i32 = arith.constant 0 : i32
    %c0_i32_0 = arith.constant 0 : i32
    %c0_i32_1 = arith.constant 0 : i32
    return %c0_i32, %c0_i32_0 : i32, i32
  }
  func.func @transform_2(%arg0: i32) -> (i32, i32) {
    %c0_i32 = arith.constant 0 : i32
    %c0_i32_0 = arith.constant 0 : i32
    %c0_i32_1 = arith.constant 0 : i32
    return %c0_i32, %c0_i32_0 : i32, i32
  }
  func.func @transform_3(%arg0: i32) -> (i32, i32) {
    %c0_i32 = arith.constant 0 : i32
    %c0_i32_0 = arith.constant 0 : i32
    %c0_i32_1 = arith.constant 0 : i32
    return %c0_i32, %c0_i32_0 : i32, i32
  }
}

</mosaic_0001>

<bundles_post_ra>
// kernel: tpu_custom_call.1
= control target key start
LH: loop header
LB: loop body
LE: loop exit
PB: predicated region body
PF: predicated region fallthrough
CT: control target
= control target key end

     0   :  { %vm19_vm0 = vcmask 64512   ;;  %s417_s0 = inlined_call_operand.vmem [shape: f32[8,128], index: 0, kind: input, shape index: {}]   ;;  %s418_s1 = inlined_call_operand.vmem [shape: s32[1,8], index: 1, kind: input, shape index: {}]   ;;  %s419_s2 = inlined_call_operand.vmem [shape: s32[8,1], index: 2, kind: input, shape index: {}]   ;;  %s420_s3 = inlined_call_operand.hbm [shape: f32[1,1], index: 3, kind: output, shape index: {}]  }
   0x1   :  { %v21_v0 = vld [vmem:[%s417_s0] sm:$0xff] }
   0x2   :  { %8 = vsyncpa [#allocation4], 0  ;;  %v342_v1 = vmov 0.0   ;;  %vm343_vm1 = vmmov 0   ;;  %v100_v4 = vlaneseq  ;;  %v151_v12 = vld [vmem:[%s419_s2] sm:$0xff]  ;;  %v344_v13 = vmov 0  }
   0x3   :  { %279 = vmatprep.subr.mxu0 %v342_v1  ;;  %281 = vmatprep.mubr.msk.f32.mxu0 %vm343_vm1, %v342_v1  ;;  %20 = vst.msk [vmem:[#allocation2] sm:$0xff] %vm19_vm0, %v342_v1  ;;  %vm165_vm3 = vcmp.ge.s32.totalorder %v151_v12, 0  ;;  %vm178_vm4 = vcmp.lt.s32.totalorder %v151_v12, 5  ;;  %v185_v43 = vmul.u32 5, %v151_v12  ;;  %v150_v44 = vld [vmem:[%s418_s1] sm:$0x1] }
   0x4   :  { %280 = vmatpush3.xpose.msra.mxu0 %v21_v0  ;;  %v376_v7 = vshrl.u32 %v100_v4, 7  ;;  %v378_v8 = vand.u32 127, %v100_v4  ;;  %296 = vset.pattern.permute.xlu1 %v344_v13  ;;  %v172_v14 = vsel %vm165_vm3, 1, %v344_v13  ;;  %v179_v15 = vsel %vm178_vm4, 1, %v344_v13  ;;  %s347_s17 = smov [#allocation3]  }
   0x5   :  { %297 = vset.pattern.permute.xlu0 %v344_v13  ;;  %174 = vperm.xlu1 %296, %v172_v14   ;;  %vm162_vm9 = vcmp.ge.s32.totalorder %v150_v44, 0  ;;  %vm163_vm10 = vcmp.lt.s32.totalorder %v150_v44, 5  ;;  %v345_v58 = vmov 6450854   ;;  %vm346_vm4 = vmmov 1   ;;  %s267_s18 = sshll.u32 %s347_s17, 4  ;;  %s268_s18 = int_to_ptr.vmem [resolvable:$true] %s267_s18 }
   0x6   :  { %vm104_vm2 = vcmp.eq.s32.totalorder %v376_v7, %v378_v8  ;;  %vm164_vm11 = vmand %vm162_vm9, %vm163_vm10  ;;  %v154_v46 = vsub.s32 0, %v376_v7  ;;  %s318_s20 = scalar_lea.vmem %s268_s18, 16  ;;  %s322_s21 = scalar_lea.vmem %s268_s18, 32 }
   0x7   :  { %282 = vmatmul.mubr.f32.vlgmr.msra.gmra.mrb[0].mxu0 %v21_v0  ;;  %v166_v45 = vsel %vm164_vm11, 1, %v344_v13  ;;  %p319_p0 = scmp.ne.s32.totalorder %s268_s18, %s318_s20  ;;  %p323_p1 = scmp.lt.s32.totalorder %s268_s18, %s268_s18 }
   0x8   :  { %v170_v48 = vrot.slane %v166_v45, %v154_v46  ;;  %v155_v53 = vrot.slane %v150_v44, %v154_v46  ;;  %p324_p2 = scmp.lt.s32.totalorder %s322_s21, %s318_s20 }
   0x9   :  { %181 = vperm.xlu1 %296, %v179_v15  }
   0xa   :  { %v22_v2 = vld [vmem:[#allocation2] sm:$0xff]  ;;  %vm171_vm12 = vcmp.eq.s32.totalorder %v170_v48, 1  ;;  %p325_p3 = por %p324_p2, %p323_p1 }
   0xc   :  { %p326_p4 = pnand %p325_p3, %p319_p0 }
   0xd   :  { %157 = vperm.xlu1 %296, %v151_v12  }
  0x84   :  { %v175_v47 = vpop.permute.xlu1 %174 }
  0x85   :  { %vm176_vm13 = vcmp.eq.s32.totalorder %v175_v47, 1 }
  0x86   :  { %vm177_vm14 = vmand %vm171_vm12, %vm176_vm13 }
  0x88   :  { %v182_v52 = vpop.permute.xlu1 %181 }
  0x89   :  { %vm183_vm15 = vcmp.eq.s32.totalorder %v182_v52, 1 }
  0x8a   :  { %vm184_vm1 = vmand %vm177_vm14, %vm183_vm15 }
  0x8c   :  { %v158_v56 = vpop.permute.xlu1 %157 }
  0x8d   :  { %vm159_vm3 = vcmp.eq.s32.totalorder %v155_v53, %v158_v56 }
  0xda   :  { %v89_v3 = vpop.f32.mrb[0].mxu0 }
  0xdb   :  { %v93_v5 = vadd.f32 %v89_v3, %v22_v2  ;;  %v283_v6 = vpop.f32.mrb[1].mxu0 }
  0xdd   :  { %95 = vst.msk [vmem:[#allocation2] sm:$0xff] %vm19_vm0, %v93_v5 }
  0xe4   :  { %v99_v9 = vld [vmem:[#allocation2] sm:$0xff] }
  0xe5   :  { %v105_v10 = vsel %vm104_vm2, %v99_v9, 0.0 }
  0xe6   :  { %v106_v11 = vsel %vm19_vm0, %v105_v10, 0.0 }
  0xe7   :  { %107 = vadd.xlane.f32.xlu0 %v106_v11  ;;  %v109_v16 = vrot.slane %v106_v11, 4 }
  0xe9   :  { %v110_v17 = vadd.f32 %v109_v16, %v106_v11 }
  0xeb   :  { %v111_v18 = vrot.slane %v110_v17, 2 }
  0xed   :  { %v112_v19 = vadd.f32 %v111_v18, %v110_v17 }
  0xef   :  { %v113_v20 = vrot.slane %v112_v19, 1 }
  0xf1   :  { %v114_v21 = vadd.f32 %v113_v20, %v112_v19 }
  0xf3   :  { %298 = vrsqrt.f32 %v114_v21  ;;  %vm127_vm5 = vcmp.eq.f32.partialorder %v114_v21, inf  ;;  %v130_v26 = vand.u32 2147483648, %v114_v21  ;;  %vm129_vm6 = vcmp.eq.f32.partialorder %v114_v21, 0.0 }
  0xfd   :  { %v299_v22 = vpop.eup %298 }
  0xfe   :  { %v126_v24 = vmul.f32 %v299_v22, %v114_v21 }
 0x100   :  { %v128_v25 = vsel %vm127_vm5, %v114_v21, %v126_v24  ;;  %vm160_vm5 = vmxor %vm104_vm2, %vm346_vm4  ;;  %vm259_vm2 = vcmask 0  }
 0x101   :  { %v131_v27 = vsel %vm129_vm6, %v130_v26, %v128_v25  ;;  %vm161_vm6 = vmand %vm159_vm3, %vm160_vm5 }
 0x102   :  { %v132_v31 = vmax.f32 %v131_v27, 1e-12  ;;  %v275_v0 = vsel %vm161_vm6, 1.0, %v342_v1 }
 0x103   :  { %v196_v3 = vsel %vm19_vm0, %v275_v0, 0.0 }
 0x174   :  { %v108_v23 = vpop.xlane.xlu0 %107 }
 0x175   :  { %300 = vrsqrt.f32 %v108_v23  ;;  %vm117_vm7 = vcmp.eq.f32.partialorder %v108_v23, inf  ;;  %v120_v30 = vand.u32 2147483648, %v108_v23  ;;  %vm119_vm8 = vcmp.eq.f32.partialorder %v108_v23, 0.0 }
 0x176   :  { %302 = vrcp.f32 %v132_v31 }
 0x17f   :  { %v301_v28 = vpop.eup %300 }
 0x180   :  { %v116_v29 = vmul.f32 %v301_v28, %v108_v23  ;;  %v303_v35 = vpop.eup %302 }
 0x181   :  { %v134_v38 = vmul.f32 2.236068, %v303_v35 }
 0x182   :  { %v118_v32 = vsel %vm117_vm7, %v108_v23, %v116_v29 }
 0x183   :  { %v121_v33 = vsel %vm119_vm8, %v120_v30, %v118_v32 }
 0x184   :  { %v122_v34 = vmax.f32 %v121_v33, 1e-12 }
 0x186   :  { %304 = vrcp.f32 %v122_v34 }
 0x190   :  { %v305_v36 = vpop.eup %304 }
 0x191   :  { %v124_v37 = vmul.f32 2.236068, %v305_v36 }
 0x193   :  { %v135_v39 = vmul.f32 %v124_v37, %v99_v9 }
 0x195   :  { %v136_v40 = vmul.f32 %v135_v39, %v134_v38 }
 0x197   :  { %137 = vst.msk [vmem:[#allocation2] sm:$0xff] %vm19_vm0, %v136_v40 }
 0x19e   :  { %v138_v41 = vld [vmem:[#allocation2] sm:$0xff] }
 0x19f   :  { %v139_v42 = vsel %vm19_vm0, %v138_v41, -inf }
 0x1a0   :  { %140 = vmax.xlane.f32.xlu0 %v139_v42 }
 0x1b6   :  { %187 = vperm.xlu0 %297, %v185_v43  }
 0x22d   :  { %v141_v49 = vpop.xlane.xlu0 %140 }
 0x22e   :  { %v142_v50 = vsub.f32 %v138_v41, %v141_v49 }
 0x230   :  { %v143_v51 = vmul.f32 1.442695, %v142_v50  ;;  %v204_v4 = vsel %vm161_vm6, %v142_v50, 0.0 }
 0x231   :  { %v205_v5 = vsel %vm19_vm0, %v204_v4, 0.0 }
 0x232   :  { %306 = vpow2.f32 %v143_v51 }
 0x235   :  { %v188_v54 = vpop.permute.xlu0 %187 }
 0x236   :  { %v189_v55 = vadd.s32 %v188_v54, %v155_v53 }
 0x238   :  { %v190_v57 = vsel %vm184_vm1, %v189_v55, 0 }
 0x239   :  { %v191_v59 = vshra.s32 %v345_v58, %v190_v57 }
 0x23b   :  { %v192_v60 = vand.u32 1, %v191_v59 }
 0x23c   :  { %v307_v61 = vpop.eup %306 }
 0x23d   :  { %v145_v62 = vsel %vm19_vm0, %v307_v61, 0.0  ;;  %vm193_vm7 = vcmp.ne.s32.totalorder %v192_v60, 0 }
 0x23e   :  { %146 = vadd.xlane.f32.xlu1 %v145_v62  ;;  %v276_v63 = vsel %vm193_vm7, 1.0, %v342_v1  ;;  %v210_v6 = vsel %vm193_vm7, %v142_v50, 0.0 }
 0x23f   :  { %v201_v2 = vsel %vm19_vm0, %v276_v63, 0.0  ;;  %v211_v7 = vsel %vm19_vm0, %v210_v6, 0.0  ;;  %vm246_vm0 = vcmask 7168  }
 0x240   :  { %202 = vadd.xlane.f32.xlu0 %v201_v2 }
 0x242   :  { %197 = vadd.xlane.f32.xlu1 %v196_v3 }
 0x246   :  { %206 = vadd.xlane.f32.xlu1 %v205_v5 }
 0x24a   :  { %212 = vadd.xlane.f32.xlu1 %v211_v7 }
 0x2cb   :  { %v147_v8 = vpop.xlane.xlu1 %146 }
 0x2cc   :  { %308 = vlog2.f32 %v147_v8 }
 0x2cd   :  { %v203_v9 = vpop.xlane.xlu0 %202 }
 0x2ce   :  { %v221_v10 = vmax.f32 %v203_v9, 1e-08 }
 0x2cf   :  { %v198_v11 = vpop.xlane.xlu1 %197 }
 0x2d0   :  { %v217_v1 = vmax.f32 %v198_v11, 1e-08  ;;  %310 = vrcp.f32 %v221_v10 }
 0x2d2   :  { %312 = vrcp.f32 %v217_v1 }
 0x2d3   :  { %v207_v12 = vpop.xlane.xlu1 %206 }
 0x2d6   :  { %v309_v13 = vpop.eup %308 }
 0x2d7   :  { %v149_v14 = vmul.f32 0.6931472, %v309_v13  ;;  %v213_v17 = vpop.xlane.xlu1 %212 }
 0x2d9   :  { %v214_v15 = vmul.f32 %v203_v9, %v149_v14  ;;  %v208_v16 = vmul.f32 %v198_v11, %v149_v14 }
 0x2da   :  { %v311_v20 = vpop.eup %310 }
 0x2db   :  { %v209_v18 = vsub.f32 %v207_v12, %v208_v16  ;;  %v215_v19 = vsub.f32 %v213_v17, %v214_v15 }
 0x2dc   :  { %v313_v23 = vpop.eup %312 }
 0x2dd   :  { %v216_v21 = vsub.f32 0.0, %v209_v18  ;;  %v220_v22 = vsub.f32 0.0, %v215_v19 }
 0x2df   :  { %v219_v24 = vmul.f32 %v313_v23, %v216_v21  ;;  %v223_v25 = vmul.f32 %v311_v20, %v220_v22 }
 0x2e1   :  { %v224_v26 = vrot.slane %v219_v24, 4  ;;  %v234_v27 = vrot.slane %v223_v25, 4 }
 0x2e3   :  { %v225_v28 = vmax.f32 %v219_v24, %v224_v26  ;;  %v235_v29 = vmax.f32 %v223_v25, %v234_v27 }
 0x2e5   :  { %v226_v30 = vrot.slane %v225_v28, 2  ;;  %v236_v31 = vrot.slane %v235_v29, 2 }
 0x2e7   :  { %v227_v32 = vmax.f32 %v225_v28, %v226_v30  ;;  %v237_v33 = vmax.f32 %v235_v29, %v236_v31 }
 0x2e9   :  { %v228_v34 = vrot.slane %v227_v32, 1  ;;  %v238_v35 = vrot.slane %v237_v33, 1 }
 0x2eb   :  { %v229_v36 = vmax.f32 %v227_v32, %v228_v34  ;;  %v239_v37 = vmax.f32 %v237_v33, %v238_v35 }
 0x2ed   :  { %284 = vpush %v229_v36 }
 0x2ee   :  { %286 = vpush %v239_v37 }
 0x31e   :  { %s285_s1 = spop %284 }
 0x31f   :  { %v231_v38 = vstv %s285_s1  ;;  %s287_s16 = spop %286 }
 0x320   :  { %314 = vrcp.f32 %v231_v38  ;;  %v241_v39 = vstv %s287_s16 }
 0x321   :  { %316 = vrcp.f32 %v241_v39 }
 0x32a   :  { %v315_v40 = vpop.eup %314 }
 0x32b   :  { %v317_v41 = vpop.eup %316  ;;  %v233_v43 = vmul.f32 %v315_v40, %v219_v24 }
 0x32c   :  { %v243_v42 = vmul.f32 %v317_v41, %v223_v25 }
 0x32e   :  { %v244_v44 = vsub.f32 1.0, %v243_v42 }
 0x330   :  { %v245_v45 = vadd.f32 %v244_v44, %v233_v43 }
 0x332   :  { %v247_v46 = vsel %vm246_vm0, %v245_v45, 0.0 }
 0x333   :  { %248 = vadd.xlane.f32.xlu1 %v247_v46 }
 0x3c0   :  { %v249_v47 = vpop.xlane.xlu1 %248 }
 0x3c1   :  { %v250_v48 = vrot.slane %v249_v47, 4 }
 0x3c3   :  { %v251_v49 = vadd.f32 %v250_v48, %v249_v47 }
 0x3c5   :  { %v252_v50 = vrot.slane %v251_v49, 2 }
 0x3c7   :  { %v253_v51 = vadd.f32 %v252_v50, %v251_v49 }
 0x3c9   :  { %v254_v52 = vrot.slane %v253_v51, 1 }
 0x3cb   :  { %v255_v53 = vadd.f32 %v254_v52, %v253_v51 }
 0x3cd   :  { %288 = vpush %v255_v53 }
 0x3fe   :  { %s289_s19 = spop %288 }
 0x3ff   :  { %v257_v54 = vstv %s289_s19 }
 0x400   :  { %v258_v55 = vmul.f32 0.125, %v257_v54 }
 0x402   :  { %260 = vst.msk [vmem:[#allocation3] sm:$0x1] %vm259_vm2, %v258_v55 }
 0x403   :  { %329 = shalt.err (!%p326_p4)
}
 0x404   :  { %s330_s24 = scalar_lea.hbm %s420_s3, 16 }
 0x405   :  { %p331_p5 = scmp.ne.s32.totalorder %s420_s3, %s330_s24  ;;  %p334_p6 = scmp.lt.u32.totalorder %s330_s24, %s420_s3 }
 0x407   :  { %p336_p7 = pnand %p334_p6, %p331_p5 }
 0x409   :  { %339 = shalt.err (!%p336_p7)
}
 0x40a   :  { %270 = dma.vmem_to_hbm [thread:$0]  %s268_s18, 16, %s420_s3, [#allocation4]  }
 0x40b   :  { %340 = dma.done.wait [#allocation4], 16  }
 0x40c   :  { %341 = vsyncadd [#allocation4], 4294967280 }
 0x40d   :  { %274 = vsyncpa [#allocation4], 1 }

</bundles_post_ra>
